<compile_context>
chip_gen: v6e
topology: v6e:2x2x1
jax: 0.10.0
libtpu: 0.0.40
codegen_flags: <defaults>
</compile_context>

<pallas_src>
import functools

import jax
import jax.numpy as jnp
import numpy as np
from jax import lax
from jax.experimental import pallas as pl
from jax.experimental.pallas import tpu as pltpu

# ----------------------------- config (from CfgNode) -----------------------------
SCORE_THRESHOLD = 0.3      # inference_cfg.class_conf_threshold
PRE_NMS_TOPK_K = 64        # inference_cfg.pre_nms_topk_k


def _xyxy_transform(c):
    """(C, C) matrix mapping row-vectors [x, y, w, h, rest] -> [x-w/2, y-h/2, x+w/2, y+h/2, rest]."""
    t = np.eye(c, dtype=np.float32)
    t[2, 2] = 0.5
    t[3, 3] = 0.5
    t[2, 0] = -0.5
    t[3, 1] = -0.5
    t[0, 2] = 1.0
    t[1, 3] = 1.0
    return jnp.asarray(t)


def _postproc_kernel(pred_ref, t_ref, out_ref, *, score_threshold):
    """BB batch rows per grid step.

    pred_ref: (BB, C, N) f32  lane-dense predictions (C = 4 box + 1 obj + n_classes)
    t_ref   : (C, C)     f32  constant xywh->xyxy transform (identity on obj/classes)
    out_ref : (BB, K, C) f32  merged output: cols 0:4 = xyxy boxes, cols 5: = scores
    """
    bb, c, n = pred_ref.shape
    k = out_ref.shape[1]

    iota_n = lax.broadcasted_iota(jnp.int32, (bb, n), 1)   # lane indices per row
    iota_k = lax.broadcasted_iota(jnp.int32, (bb, k), 1)
    neg_big = jnp.float32(-1e30)

    # Objectness = sublane 4 of each (C, N) tile: free slice, already lane-dense.
    work0 = pred_ref[:, 4, :]                    # (BB, N)
    idxs0 = jnp.zeros((bb, k), jnp.int32)        # selected indices, tiny vreg carry

    # Iterative argmax top-k; BB independent chains advance per XLU reduction.
    # Lowest index wins ties (matches lax.top_k / torch.topk).
    def topk_body(j, carry):
        work, idxs = carry
        m = jnp.max(work, axis=1, keepdims=True)                                # (BB, 1)
        idx = jnp.min(jnp.where(work == m, iota_n, n), axis=1, keepdims=True)   # (BB, 1) i32
        idxs = jnp.where(iota_k == j, idx, idxs)                                # place col j
        work = jnp.where(iota_n == idx, neg_big, work)                          # suppress
        return work, idxs

    _, idxs = lax.fori_loop(0, k, topk_body, (work0, idxs0))

    # Build the one-hot selection ONCE (no per-iteration scratch stores), then gather the
    # K selected anchors for all BB rows with a single batched MXU einsum.
    sel = (idxs[:, :, None] ==
           lax.broadcasted_iota(jnp.int32, (bb, k, n), 2)).astype(jnp.float32)  # (BB, K, N)
    pred_v = pred_ref[...]                                                       # (BB, C, N)
    gathered = jnp.einsum('bkn,bcn->bkc', sel, pred_v,
                          preferred_element_type=jnp.float32)                    # (BB, K, C)

    col = lax.broadcasted_iota(jnp.int32, (k, c), 1)
    for b in range(bb):   # static, bb <= 8: tiny per-row epilogue
        # xywh -> xyxy (identity on obj/class columns); col 4 = top-k objectness value.
        tr = jnp.dot(gathered[b], t_ref[...], preferred_element_type=jnp.float32)  # (K, C)
        valid = tr[:, 4:5]
        valid = valid * (valid > score_threshold).astype(jnp.float32)
        scored = tr * valid
        scored = scored * (scored > score_threshold).astype(jnp.float32)
        # cols 0:4 boxes from `tr`, cols 5: thresholded per-class scores.
        out_ref[b] = jnp.where(col >= 5, scored, tr)


def _vmem_limit_bytes(bb, c, n, k):
    """Scoped-VMEM request sized from the real (lane-dense) footprint, clamped to a
    range that is safe on v5e (16 MiB default scoped) through v7x (64 MiB physical)."""
    pred = 2 * bb * c * n * 4        # double-buffered input block
    outb = 2 * bb * k * c * 4        # double-buffered output block
    sel = bb * k * n * 4             # post-loop one-hot gather operand (spilled value)
    slack = 4 * bb * n * 4 + (1 << 20)
    need = pred + outb + sel + slack
    return int(min(max(2 * need, 32 << 20), 48 << 20))


def ipu_predictions_postprocessing(predictions,
                                   *,
                                   k=PRE_NMS_TOPK_K,
                                   score_threshold=SCORE_THRESHOLD):
    """predictions: (B, N, 5 + n_classes) f32  ->  (scores (B,K,nc), boxes (B,K,4))."""
    b, n, c = predictions.shape
    assert k <= n, f"pre_nms_topk_k ({k}) must be <= number of predictions ({n})"

    # Batch block: largest of 8/4/2/1 dividing B -> fills sublanes in the argmax loop
    # and gives BB independent argmax chains per grid step.
    bb = 1
    for cand in (8, 4, 2, 1):
        if b % cand == 0:
            bb = cand
            break

    # Lane-dense layout: N on the lane axis, C=16 on sublanes (no lane padding in VMEM).
    pred_t = jnp.transpose(predictions, (0, 2, 1))     # (B, C, N)
    t_mat = _xyxy_transform(c)

    kernel = functools.partial(_postproc_kernel, score_threshold=score_threshold)

    merged = pl.pallas_call(
        kernel,
        out_shape=jax.ShapeDtypeStruct((b, k, c), jnp.float32),
        grid_spec=pltpu.PrefetchScalarGridSpec(
            num_scalar_prefetch=0,
            grid=(b // bb,),
            in_specs=[
                pl.BlockSpec((bb, c, n), lambda i: (i, 0, 0)),   # lane-dense predictions
                pl.BlockSpec((c, c), lambda i: (0, 0)),          # constant xyxy transform
            ],
            out_specs=pl.BlockSpec((bb, k, c), lambda i: (i, 0, 0)),
        ),
        compiler_params=pltpu.CompilerParams(
            dimension_semantics=("parallel",),                   # batch axis: v7x 2-TC split
            vmem_limit_bytes=_vmem_limit_bytes(bb, c, n, k),
        ),
    )(pred_t, t_mat)

    scores_out = merged[..., 5:]      # (B, K, n_classes)
    boxes_out = merged[..., :4]       # (B, K, 4)
    return scores_out, boxes_out


# ----------------------------- pure-JAX reference -----------------------------
def _reference(predictions, k, score_threshold):
    x, y, w, h = (predictions[..., 0], predictions[..., 1],
                  predictions[..., 2], predictions[..., 3])
    boxes = jnp.stack([x - w / 2, y - h / 2, x + w / 2, y + h / 2], axis=-1)
    scores = predictions[..., 4]
    one_hot = predictions[..., 5:]
    vals, idx = lax.top_k(scores, k)
    vals = vals * (vals > score_threshold)
    one_hot_g = jnp.take_along_axis(one_hot, idx[..., None], axis=1)
    mult = one_hot_g * vals[..., None]
    scores_out = mult * (mult > score_threshold)
    boxes_g = jnp.take_along_axis(boxes, idx[..., None], axis=1)
    return scores_out, boxes_g


if __name__ == "__main__":
    B, N, N_CLASSES = 2, 256, 11
    C = 5 + N_CLASSES

    key = jax.random.PRNGKey(0)
    kb, ks, kc = jax.random.split(key, 3)
    boxes_xywh = jax.random.uniform(kb, (B, N, 4), jnp.float32, 0.0, 416.0)
    objectness = jax.random.uniform(ks, (B, N, 1), jnp.float32, 0.0, 1.0)
    class_scores = jax.random.uniform(kc, (B, N, N_CLASSES), jnp.float32, 0.0, 1.0)
    predictions = jnp.concatenate([boxes_xywh, objectness, class_scores], axis=-1)

    scores_out, boxes_out = ipu_predictions_postprocessing(predictions)
    jax.block_until_ready((scores_out, boxes_out))

    ref_scores, ref_boxes = _reference(predictions, PRE_NMS_TOPK_K, SCORE_THRESHOLD)
    np.testing.assert_allclose(np.asarray(scores_out), np.asarray(ref_scores),
                               rtol=1e-5, atol=1e-5)
    np.testing.assert_allclose(np.asarray(boxes_out), np.asarray(ref_boxes),
                               rtol=1e-5, atol=1e-4)

    print("KERNEL_OK")
</pallas_src>

<mosaic_0001>
module attributes {stable_mosaic.version = 11 : i64} {
  func.func @_postproc_kernel(%arg0: i32, %arg1: memref<2x16x256xf32, #tpu.memory_space<vmem>>, %arg2: memref<16x16xf32, #tpu.memory_space<vmem>>, %arg3: memref<2x64x16xf32, #tpu.memory_space<vmem>>) attributes {dimension_semantics = [#tpu.dimension_semantics<parallel>], iteration_bounds = array<i64: 1>, scalar_prefetch = 0 : i64, scratch_operands = 0 : i64, tpu.core_type = #tpu.core_type<tc>, window_params = [{transform_indices = @transform_0, window_bounds = array<i64: 2, 16, 256>}, {pipeline_mode = #tpu.pipeline_mode<synchronous>, transform_indices = @transform_1, window_bounds = array<i64: 16, 16>}, {transform_indices = @transform_2, window_bounds = array<i64: 2, 64, 16>}]} {
    %0 = tpu.iota {dimensions = array<i32: 1>} : vector<2x256xi32>
    %1 = tpu.iota {dimensions = array<i32: 1>} : vector<2x64xi32>
    %c0 = arith.constant 0 : index
    %c4 = arith.constant 4 : index
    %c0_0 = arith.constant 0 : index
    %2 = vector.load %arg1[%c0, %c4, %c0_0] : memref<2x16x256xf32, #tpu.memory_space<vmem>>, vector<2x1x256xf32>
    %3 = vector.shape_cast %2 : vector<2x1x256xf32> to vector<2x256xf32>
    %c0_i32 = arith.constant 0 : i32
    %4 = vector.broadcast %c0_i32 : i32 to vector<2x64xi32>
    %cst = arith.constant -1.000000e+30 : f32
    %c0_i32_1 = arith.constant 0 : i32
    %c64_i32 = arith.constant 64 : i32
    %5 = arith.addi %c0_i32_1, %c64_i32 : i32
    %c1_i32 = arith.constant 1 : i32
    %6:2 = scf.for %arg4 = %c0_i32_1 to %5 step %c1_i32 iter_args(%arg5 = %3, %arg6 = %4) -> (vector<2x256xf32>, vector<2x64xi32>)  : i32 {
      %cst_23 = arith.constant dense<0xFF800000> : vector<2xf32>
      %62 = vector.multi_reduction <maximumf>, %arg5, %cst_23 [1] : vector<2x256xf32> to vector<2xf32>
      %63 = vector.shape_cast %62 : vector<2xf32> to vector<2x1xf32>
      %64 = vector.broadcast %63 : vector<2x1xf32> to vector<2x256xf32>
      %65 = arith.cmpf oeq, %arg5, %64 : vector<2x256xf32>
      %c256_i32 = arith.constant 256 : i32
      %66 = vector.broadcast %c256_i32 : i32 to vector<2x256xi32>
      %67 = arith.select %65, %0, %66 : vector<2x256xi1>, vector<2x256xi32>
      %cst_24 = arith.constant dense<2147483647> : vector<2xi32>
      %68 = vector.multi_reduction <minsi>, %67, %cst_24 [1] : vector<2x256xi32> to vector<2xi32>
      %69 = vector.shape_cast %68 : vector<2xi32> to vector<2x1xi32>
      %70 = vector.broadcast %arg4 : i32 to vector<2x64xi32>
      %71 = arith.cmpi eq, %1, %70 : vector<2x64xi32>
      %72 = vector.shape_cast %69 : vector<2x1xi32> to vector<2x1xi32>
      %73 = vector.broadcast %72 : vector<2x1xi32> to vector<2x64xi32>
      %74 = arith.select %71, %73, %arg6 : vector<2x64xi1>, vector<2x64xi32>
      %75 = vector.broadcast %69 : vector<2x1xi32> to vector<2x256xi32>
      %76 = arith.cmpi eq, %0, %75 : vector<2x256xi32>
      %77 = vector.broadcast %cst : f32 to vector<2x256xf32>
      %78 = arith.select %76, %77, %arg5 : vector<2x256xi1>, vector<2x256xf32>
      scf.yield %78, %74 : vector<2x256xf32>, vector<2x64xi32>
    }
    %c64_i32_2 = arith.constant 64 : i32
    %7 = vector.shape_cast %6#1 : vector<2x64xi32> to vector<2x64x1xi32>
    %8 = tpu.iota {dimensions = array<i32: 2>} : vector<2x64x256xi32>
    %9 = vector.broadcast %7 : vector<2x64x1xi32> to vector<2x64x256xi32>
    %10 = arith.cmpi eq, %9, %8 : vector<2x64x256xi32>
    %11 = arith.extui %10 : vector<2x64x256xi1> to vector<2x64x256xi32>
    %12 = arith.sitofp %11 : vector<2x64x256xi32> to vector<2x64x256xf32>
    %c0_3 = arith.constant 0 : index
    %c0_4 = arith.constant 0 : index
    %c0_5 = arith.constant 0 : index
    %13 = vector.load %arg1[%c0_3, %c0_4, %c0_5] : memref<2x16x256xf32, #tpu.memory_space<vmem>>, vector<2x16x256xf32>
    "tpu.trace_start"() <{level = 10 : i32, message = "bkn,bcn->bkc"}> : () -> ()
    %cst_6 = arith.constant dense<0.000000e+00> : vector<2x64x16xf32>
    %14 = tpu.matmul %12, %13, %cst_6 {dimension_numbers = #tpu.dot_dimension_numbers<[2], [2], [1], [1], [0, 0, 0, 1, 1, 1], [0], [0]>} : vector<2x64x256xf32>, vector<2x16x256xf32>, vector<2x64x16xf32> -> vector<2x64x16xf32>
    "tpu.trace_stop"() : () -> ()
    %15 = tpu.iota {dimensions = array<i32: 1>} : vector<64x16xi32>
    %16 = vector.extract_strided_slice %14 {offsets = [0, 0, 0], sizes = [1, 64, 16], strides = [1, 1, 1]} : vector<2x64x16xf32> to vector<1x64x16xf32>
    %17 = vector.shape_cast %16 : vector<1x64x16xf32> to vector<64x16xf32>
    %c0_7 = arith.constant 0 : index
    %c0_8 = arith.constant 0 : index
    %18 = vector.load %arg2[%c0_7, %c0_8] : memref<16x16xf32, #tpu.memory_space<vmem>>, vector<16x16xf32>
    %cst_9 = arith.constant dense<0.000000e+00> : vector<64x16xf32>
    %19 = tpu.matmul %17, %18, %cst_9 {dimension_numbers = #tpu.dot_dimension_numbers<[1], [0], [0], [1], [0, 0, 1, 1], [], []>} : vector<64x16xf32>, vector<16x16xf32>, vector<64x16xf32> -> vector<64x16xf32>
    %20 = vector.extract_strided_slice %19 {offsets = [0, 4], sizes = [64, 1], strides = [1, 1]} : vector<64x16xf32> to vector<64x1xf32>
    %cst_10 = arith.constant 3.000000e-01 : f32
    %21 = vector.broadcast %cst_10 : f32 to vector<64x1xf32>
    %22 = arith.cmpf ogt, %20, %21 : vector<64x1xf32>
    %23 = arith.extui %22 : vector<64x1xi1> to vector<64x1xi32>
    %24 = arith.sitofp %23 : vector<64x1xi32> to vector<64x1xf32>
    %25 = arith.mulf %20, %24 : vector<64x1xf32>
    %26 = vector.broadcast %25 : vector<64x1xf32> to vector<64x16xf32>
    %27 = arith.mulf %19, %26 : vector<64x16xf32>
    %cst_11 = arith.constant 3.000000e-01 : f32
    %28 = vector.broadcast %cst_11 : f32 to vector<64x16xf32>
    %29 = arith.cmpf ogt, %27, %28 : vector<64x16xf32>
    %30 = arith.extui %29 : vector<64x16xi1> to vector<64x16xi32>
    %31 = arith.sitofp %30 : vector<64x16xi32> to vector<64x16xf32>
    %32 = arith.mulf %27, %31 : vector<64x16xf32>
    %c5_i32 = arith.constant 5 : i32
    %33 = vector.broadcast %c5_i32 : i32 to vector<64x16xi32>
    %34 = arith.cmpi sge, %15, %33 : vector<64x16xi32>
    %35 = arith.select %34, %32, %19 : vector<64x16xi1>, vector<64x16xf32>
    %c0_12 = arith.constant 0 : index
    %c0_13 = arith.constant 0 : index
    %c0_14 = arith.constant 0 : index
    %36 = vector.load %arg3[%c0_12, %c0_13, %c0_14] : memref<2x64x16xf32, #tpu.memory_space<vmem>>, vector<1x64x16xf32>
    %37 = vector.shape_cast %36 : vector<1x64x16xf32> to vector<64x16xf32>
    %38 = vector.shape_cast %35 : vector<64x16xf32> to vector<1x64x16xf32>
    tpu.vector_store %arg3[%c0_12, %c0_13, %c0_14], %38 {strides = array<i32>} : memref<2x64x16xf32, #tpu.memory_space<vmem>>, vector<1x64x16xf32>,
    %39 = vector.extract_strided_slice %14 {offsets = [1, 0, 0], sizes = [1, 64, 16], strides = [1, 1, 1]} : vector<2x64x16xf32> to vector<1x64x16xf32>
    %40 = vector.shape_cast %39 : vector<1x64x16xf32> to vector<64x16xf32>
    %c0_15 = arith.constant 0 : index
    %c0_16 = arith.constant 0 : index
    %41 = vector.load %arg2[%c0_15, %c0_16] : memref<16x16xf32, #tpu.memory_space<vmem>>, vector<16x16xf32>
    %cst_17 = arith.constant dense<0.000000e+00> : vector<64x16xf32>
    %42 = tpu.matmul %40, %41, %cst_17 {dimension_numbers = #tpu.dot_dimension_numbers<[1], [0], [0], [1], [0, 0, 1, 1], [], []>} : vector<64x16xf32>, vector<16x16xf32>, vector<64x16xf32> -> vector<64x16xf32>
    %43 = vector.extract_strided_slice %42 {offsets = [0, 4], sizes = [64, 1], strides = [1, 1]} : vector<64x16xf32> to vector<64x1xf32>
    %cst_18 = arith.constant 3.000000e-01 : f32
    %44 = vector.broadcast %cst_18 : f32 to vector<64x1xf32>
    %45 = arith.cmpf ogt, %43, %44 : vector<64x1xf32>
    %46 = arith.extui %45 : vector<64x1xi1> to vector<64x1xi32>
    %47 = arith.sitofp %46 : vector<64x1xi32> to vector<64x1xf32>
    %48 = arith.mulf %43, %47 : vector<64x1xf32>
    %49 = vector.broadcast %48 : vector<64x1xf32> to vector<64x16xf32>
    %50 = arith.mulf %42, %49 : vector<64x16xf32>
    %cst_19 = arith.constant 3.000000e-01 : f32
    %51 = vector.broadcast %cst_19 : f32 to vector<64x16xf32>
    %52 = arith.cmpf ogt, %50, %51 : vector<64x16xf32>
    %53 = arith.extui %52 : vector<64x16xi1> to vector<64x16xi32>
    %54 = arith.sitofp %53 : vector<64x16xi32> to vector<64x16xf32>
    %55 = arith.mulf %50, %54 : vector<64x16xf32>
    %c5_i32_20 = arith.constant 5 : i32
    %56 = vector.broadcast %c5_i32_20 : i32 to vector<64x16xi32>
    %57 = arith.cmpi sge, %15, %56 : vector<64x16xi32>
    %58 = arith.select %57, %55, %42 : vector<64x16xi1>, vector<64x16xf32>
    %c1 = arith.constant 1 : index
    %c0_21 = arith.constant 0 : index
    %c0_22 = arith.constant 0 : index
    %59 = vector.load %arg3[%c1, %c0_21, %c0_22] : memref<2x64x16xf32, #tpu.memory_space<vmem>>, vector<1x64x16xf32>
    %60 = vector.shape_cast %59 : vector<1x64x16xf32> to vector<64x16xf32>
    %61 = vector.shape_cast %58 : vector<64x16xf32> to vector<1x64x16xf32>
    tpu.vector_store %arg3[%c1, %c0_21, %c0_22], %61 {strides = array<i32>} : memref<2x64x16xf32, #tpu.memory_space<vmem>>, vector<1x64x16xf32>,
    return
  }
  func.func @transform_0(%arg0: i32) -> (i32, i32, i32) {
    %c0_i32 = arith.constant 0 : i32
    %c0_i32_0 = arith.constant 0 : i32
    %c0_i32_1 = arith.constant 0 : i32
    return %arg0, %c0_i32, %c0_i32_0 : i32, i32, i32
  }
  func.func @transform_1(%arg0: i32) -> (i32, i32) {
    %c0_i32 = arith.constant 0 : i32
    %c0_i32_0 = arith.constant 0 : i32
    %c0_i32_1 = arith.constant 0 : i32
    return %c0_i32, %c0_i32_0 : i32, i32
  }
  func.func @transform_2(%arg0: i32) -> (i32, i32, i32) {
    %c0_i32 = arith.constant 0 : i32
    %c0_i32_0 = arith.constant 0 : i32
    %c0_i32_1 = arith.constant 0 : i32
    return %arg0, %c0_i32, %c0_i32_0 : i32, i32, i32
  }
}

</mosaic_0001>

<bundles_post_ra>
// kernel: tpu_custom_call.1
= control target key start
LH: loop header
LB: loop body
LE: loop exit
PB: predicated region body
PF: predicated region fallthrough
CT: control target
= control target key end

     0   :  { %7 = vsyncpa [#allocation3], 0  ;;  %s1694_s0 = inlined_call_operand.hbm [shape: f32[2,16,256], index: 0, kind: input, shape index: {}]   ;;  %s1695_s1 = inlined_call_operand.hbm [shape: f32[16,16], index: 1, kind: input, shape index: {}]   ;;  %s1696_s2 = inlined_call_operand.vmem [shape: f32[2,64,16], index: 2, kind: output, shape index: {}]  }
   0x1   :  { %8 = vsyncpa [#allocation5], 0  ;;  %s1334_s9 = smov [#allocation2]  }
   0x2   :  { %s14_s10 = sshll.u32 %s1334_s9, 4  ;;  %s15_s10 = int_to_ptr.vmem [resolvable:$true] %s14_s10 }
   0x3   :  { %s1266_s11 = scalar_lea.vmem %s15_s10, 1024  ;;  %p1271_p1 = scmp.lt.s32.totalorder %s15_s10, %s15_s10 }
   0x4   :  { %p1267_p0 = scmp.ne.s32.totalorder %s15_s10, %s1266_s11  ;;  %p1272_p2 = scmp.lt.s32.totalorder %s1266_s11, %s1266_s11 }
   0x6   :  { %p1273_p3 = por %p1272_p2, %p1271_p1 }
   0x8   :  { %p1274_p4 = pnand %p1273_p3, %p1267_p0 }
   0xa   :  { %1277 = shalt.err (!%p1274_p4)
}
   0xb   :  { %s1335_s12 = smov 256   ;;  %s1336_s13 = smov 16  }
   0xc   :  { %20 = dma.hbm_to_vmem [thread:$0]  %s1694_s0, 1024, %s15_s10, [#allocation3], %s1335_s12, %s1335_s12, %s1336_s13  }
   0xd   :  { %s1337_s16 = smov [#allocation4]  }
   0xe   :  { %s26_s17 = sshll.u32 %s1337_s16, 4  ;;  %s27_s17 = int_to_ptr.vmem [resolvable:$true] %s26_s17 }
   0xf   :  { %s1286_s18 = scalar_lea.vmem %s27_s17, 256  ;;  %p1291_p6 = scmp.lt.s32.totalorder %s27_s17, %s27_s17 }
  0x10   :  { %p1287_p5 = scmp.ne.s32.totalorder %s27_s17, %s1286_s18  ;;  %p1292_p7 = scmp.lt.s32.totalorder %s1286_s18, %s1286_s18 }
  0x12   :  { %p1293_p8 = por %p1292_p7, %p1291_p6 }
  0x14   :  { %p1294_p9 = pnand %p1293_p8, %p1287_p5 }
  0x16   :  { %1297 = shalt.err (!%p1294_p9)
}
  0x17   :  { %s1338_s19 = smov 128   ;;  %s1339_s20 = smov 8  }
  0x18   :  { %32 = dma.hbm_to_vmem [thread:$0]  %s1695_s1, 256, %s27_s17, [#allocation5], %s1338_s19, %s1338_s19, %s1339_s20  }
  0x19   :  { %1314 = dma.done.wait [#allocation3], 1024  }
  0x1a   :  { %1315 = vsyncadd [#allocation3], 4294966272 }
  0x1b   :  { %1316 = dma.done.wait [#allocation5], 256  }
  0x1c   :  { %1317 = vsyncadd [#allocation5], 4294967040  ;;  %v39_v0 = vlaneseq  ;;  %v1340_v1 = vmov 1966171168   ;;  %v1318_v15 = vmov 0   ;;  %s1373_s0 = smov 0  }
  0x1d   :  { %v50_v2 = vunpack.c.l.s4 %v1340_v1  ;;  %v43_v8 = vld [vmem:[#allocation2 + $0x4] ss:$8 sm:$0x3] }
  0x1e   :  { %v1365_v3 = vand.u32 127, %v39_v0  ;;  %v1367_v4 = vshrl.u32 %v39_v0, 7  ;;  %v45_v9 = vld [vmem:[#allocation2 + $0x24] ss:$8 sm:$0x3] }
  0x1f   :  { %v51_v5 = vunpack.c.0.s8 %v50_v2  ;;  %v48_v10 = vcombine.low %v43_v8, %v45_v9 }
  0x20   :  { %v1370_v6 = vadd.s32 128, %v1365_v3 }
  0x21   :  { %v54_v7 = vsub.s32 %v51_v5, %v1367_v4 }
  0x23   :  { %v55_v11 = vrot.slane %v48_v10, %v54_v7 }
  0x25   :  { %v56_v12 = vcombine.high %v55_v11, %v55_v11  ;;  %v63_v13 = vrot.slane %v55_v11, %v54_v7  }
  0x27   :  { %v70_v14 = vrot.slane %v56_v12, %v54_v7   ;;  %v1326_v17 = vmov %v63_v13  }
  0x29   :  { %v1322_v16 = vmov %v70_v14  }
  0x2a LB: > { %vm82_vm0 = vcmask 1041408   ;;  %v110_v34 = vstv %s1332_s0  ;;  %s78_s0 = sadd.s32 1, %s1332_s0   ;;  %s1332_s0 = sphi %s1373_s0, %s78_s0   ;;  %v1328_v17 = vphi %v1326_v17, %v115_v17   ;;  %v1324_v16 = vphi %v1322_v16, %v116_v16   ;;  %v1320_v15 = vphi %v1318_v15, %v1319_v15  }
  0x2b   : > { %v83_v18 = vsel %vm82_vm0, %v1328_v17, -inf  ;;  %v84_v19 = vsel %vm82_vm0, %v1324_v16, -inf  ;;  %vm111_vm5 = vcmp.eq.s32.totalorder %v1365_v3, %v110_v34  ;;  %p75_p10 = scmp.ge.s32.totalorder %s78_s0, 64  }
  0x2c   : > { %v85_v20 = vmax.f32 %v83_v18, %v84_v19  ;;  %v119_v40 = vsub.s32 (%p75_p10), 0, %v1367_v4  ;;  %v154_v41 = vsub.s32 (%p75_p10), 1, %v1367_v4  ;;  %v286_v42 = vld [vmem:[#allocation2 + $0x18] sm:$0xff] (%p75_p10)  ;;  %v285_v43 = vld [vmem:[#allocation2 + $0x10] sm:$0xff] (%p75_p10)  ;;  %v284_v44 = vld [vmem:[#allocation2 + $0x8] sm:$0xff] (%p75_p10)  ;;  %v1341_v55 = vmov (%p75_p10), 1.0  }
  0x2d   :  { %319 = vmatprep.subr.mxu0 (%p75_p10), %v286_v42  ;;  %v290_v45 = vld [vmem:[#allocation2 + $0x38] sm:$0xff] (%p75_p10)  ;;  %v289_v46 = vld [vmem:[#allocation2 + $0x30] sm:$0xff] (%p75_p10)  ;;  %v288_v48 = vld [vmem:[#allocation2 + $0x28] sm:$0xff] (%p75_p10) }
  0x2e   : > { %86 = vmax.xlane.f32.xlu0 %v85_v20  ;;  %320 = vmatpush1.xpose.msra.mxu0 (%p75_p10), %v285_v43  ;;  %v283_v49 = vld [vmem:[#allocation2] sm:$0xff] (%p75_p10)  ;;  %v502_v52 = vld [vmem:[#allocation4 + $0x8] sm:$0xff] (%p75_p10)  ;;  %v1343_v43 = vmov (%p75_p10), 0.0  }
  0x2f   :  { %424 = vmatprep.subr.mxu1 (%p75_p10), %v290_v45  ;;  %321 = vmatprep.subr.mxu0 (%p75_p10), %v284_v44  ;;  %v287_v51 = vld [vmem:[#allocation2 + $0x20] sm:$0xff] (%p75_p10) }
  0x30   :  { %425 = vmatpush1.xpose.msra.mxu1 (%p75_p10), %v289_v46  ;;  %v501_v56 = vld [vmem:[#allocation4] sm:$0xff] (%p75_p10) }
  0x31   :  { %426 = vmatprep.subr.mxu1 (%p75_p10), %v288_v48 }
  0x32   :  { %322 = vmatpush1.xpose.msra.mxu0 (%p75_p10), %v283_v49 }
  0x33   :  { %1182 = vmatprep.subr.mxu0 (%p75_p10), %v502_v52 }
  0x34   :  { %427 = vmatpush1.xpose.msra.mxu1 (%p75_p10), %v287_v51 }
  0x35   :  { %1198 = vmatprep.subr.mxu1 (%p75_p10), %v502_v52 }
  0xb7   : > { %v87_v21 = vpop.xlane.xlu0 %86 }
  0xb8   : > { %vm88_vm1 = vcmp.eq.f32.partialorder %v1328_v17, %v87_v21  ;;  %vm89_vm2 = vcmp.eq.f32.partialorder %v1324_v16, %v87_v21 }
  0xb9   : > { %v90_v22 = vsel %vm88_vm1, %v1365_v3, 256  ;;  %v91_v23 = vsel %vm89_vm2, %v1370_v6, 256 }
  0xba   : > { %v92_v24 = vsel %vm82_vm0, %v90_v22, 2147483647  ;;  %v93_v25 = vsel %vm82_vm0, %v91_v23, 2147483647 }
  0xbb   : > { %vm94_vm3 = vcmp.lt.s32.totalorder %v92_v24, %v93_v25 }
  0xbc   : > { %v95_v26 = vsel %vm94_vm3, %v92_v24, %v93_v25 }
  0xbd   : > { %v97_v27 = vshra.s32 %v95_v26, 16  ;;  %v96_v29 = vand.u32 65535, %v95_v26 }
  0xbf   : > { %v99_v28 = vcvt.s32.f32 %v97_v27  ;;  %v98_v31 = vcvt.s32.f32 %v96_v29 }
  0xc1   : > { %100 = vmin.xlane.f32.xlu0 %v99_v28 }
 0x14a   : > { %v101_v30 = vpop.xlane.xlu0 %100 }
 0x14b   : > { %vm102_vm4 = vcmp.eq.f32.partialorder %v99_v28, %v101_v30  ;;  %v107_v33 = vcvt.f32.s32 %v101_v30 }
 0x14c   : > { %v103_v32 = vsel %vm102_vm4, %v98_v31, inf }
 0x14d   : > { %104 = vmin.xlane.f32.xlu1 %v103_v32  ;;  %v108_v36 = vshll.u32 %v107_v33, 16 }
 0x1d6   : > { %v105_v35 = vpop.xlane.xlu1 %104 }
 0x1d7   : > { %v106_v37 = vcvt.f32.s32 %v105_v35 }
 0x1d8   :  { %77 = sbr.rel (!%p75_p10) target bundleno = 42 (0x2a), region = 46 }
 0x1d9   : > { %v109_v38 = vadd.s32 %v108_v36, %v106_v37 }
 0x1db   : > { %v112_v39 = vsel %vm111_vm5, %v109_v38, %v1320_v15   ;;  %vm113_vm6 = vcmp.eq.s32.totalorder %v1365_v3, %v109_v38  ;;  %vm114_vm7 = vcmp.eq.s32.totalorder %v1370_v6, %v109_v38 }
 0x1dc   : > { %v115_v17 = vsel %vm113_vm6, -1e+30, %v1328_v17   ;;  %v116_v16 = vsel %vm114_vm7, -1e+30, %v1324_v16   ;;  %v1319_v15 = vmov %v112_v39   ;;  %v120_v47 = vrot.slane (%p75_p10), %v112_v39, %v119_v40 }
 0x1dd   :  { %v155_v50 = vrot.slane %v112_v39, %v154_v41  ;;  %v1342_v40 = vmov 4  }
 0x1de   :  { %122 = vbcast.lane.b32.xlu0 %v120_v47, 256  ;;  %126 = vbcast.lane.b32.xlu1 %v120_v47, 264 }
 0x1df   :  { %1256 = vset.pattern.permute.xlu1 %v1342_v40  ;;  %1257 = vset.pattern.permute.xlu0 %v1342_v40 }
 0x1e2   :  { %157 = vbcast.lane.b32.xlu0 %v155_v50, 256  ;;  %161 = vbcast.lane.b32.xlu1 %v155_v50, 264 }
 0x1e6   :  { %130 = vbcast.lane.b32.xlu0 %v120_v47, 272  ;;  %165 = vbcast.lane.b32.xlu1 %v155_v50, 272 }
 0x1ea   :  { %134 = vbcast.lane.b32.xlu0 %v120_v47, 280  ;;  %169 = vbcast.lane.b32.xlu1 %v155_v50, 280 }
 0x1ee   :  { %138 = vbcast.lane.b32.xlu0 %v120_v47, 288  ;;  %173 = vbcast.lane.b32.xlu1 %v155_v50, 288 }
 0x1f2   :  { %142 = vbcast.lane.b32.xlu0 %v120_v47, 296  ;;  %177 = vbcast.lane.b32.xlu1 %v155_v50, 296 }
 0x1f6   :  { %146 = vbcast.lane.b32.xlu0 %v120_v47, 304  ;;  %181 = vbcast.lane.b32.xlu1 %v155_v50, 304 }
 0x1fa   :  { %150 = vbcast.lane.b32.xlu0 %v120_v47, 312  ;;  %185 = vbcast.lane.b32.xlu1 %v155_v50, 312 }
 0x250   :  { %v123_v53 = vpop.permute.xlu0 %122  ;;  %v127_v54 = vpop.permute.xlu1 %126 }
 0x251   :  { %vm187_vm8 = vcmp.eq.s32.totalorder %v123_v53, %v1365_v3  ;;  %vm188_vm9 = vcmp.eq.s32.totalorder %v123_v53, %v1370_v6  ;;  %vm190_vm10 = vcmp.eq.s32.totalorder %v127_v54, %v1370_v6  ;;  %vm189_vm11 = vcmp.eq.s32.totalorder %v127_v54, %v1365_v3 }
 0x252   :  { %1074 = vmatprep.mubr.msk.f32.mxu0 %vm188_vm9, %v1341_v55 }
 0x253   :  { %1075 = vmatmul.mubr.msk.f32.vlgmr.msra.gmra.mxu0 %vm187_vm8, %v1341_v55 }
 0x254   :  { %v158_v57 = vpop.permute.xlu0 %157  ;;  %1076 = vmatprep.mubr.msk.f32.mxu0 %vm190_vm10, %v1341_v55  ;;  %v162_v58 = vpop.permute.xlu1 %161  ;;  %1183 = vmatpush3.msra.mxu0 %v502_v52 }
 0x255   :  { %vm203_vm12 = vcmp.eq.s32.totalorder %v158_v57, %v1365_v3  ;;  %vm204_vm13 = vcmp.eq.s32.totalorder %v158_v57, %v1370_v6  ;;  %vm206_vm14 = vcmp.eq.s32.totalorder %v162_v58, %v1370_v6  ;;  %1184 = vmatprep.subr.mxu0 %v501_v56  ;;  %vm205_vm15 = vcmp.eq.s32.totalorder %v162_v58, %v1365_v3 }
 0x256   :  { %1090 = vmatprep.mubr.msk.f32.mxu1 %vm204_vm13, %v1341_v55  ;;  %1185 = vmatpush3.msra.mxu0 %v501_v56 }
 0x257   :  { %1077 = vmatmul.mubr.msk.f32.gmra.mxu0 %vm189_vm11, %v1341_v55  ;;  %1091 = vmatmul.mubr.msk.f32.vlgmr.msra.gmra.mxu1 %vm203_vm12, %v1341_v55 }
 0x258   :  { %v131_v59 = vpop.permute.xlu0 %130  ;;  %1092 = vmatprep.mubr.msk.f32.mxu1 %vm206_vm14, %v1341_v55  ;;  %v166_v60 = vpop.permute.xlu1 %165  ;;  %1199 = vmatpush3.msra.mxu1 %v502_v52 }
 0x259   :  { %vm191_vm0 = vcmp.eq.s32.totalorder %v131_v59, %v1365_v3  ;;  %vm192_vm1 = vcmp.eq.s32.totalorder %v131_v59, %v1370_v6  ;;  %vm208_vm2 = vcmp.eq.s32.totalorder %v166_v60, %v1370_v6  ;;  %1200 = vmatprep.subr.mxu1 %v501_v56  ;;  %vm207_vm3 = vcmp.eq.s32.totalorder %v166_v60, %v1365_v3 }
 0x25a   :  { %1078 = vmatprep.mubr.msk.f32.mxu0 %vm192_vm1, %v1341_v55  ;;  %1201 = vmatpush3.msra.mxu1 %v501_v56 }
 0x25b   :  { %1079 = vmatmul.mubr.msk.f32.gmra.mxu0 %vm191_vm0, %v1341_v55  ;;  %1093 = vmatmul.mubr.msk.f32.gmra.mxu1 %vm205_vm15, %v1341_v55 }
 0x25c   :  { %v135_v61 = vpop.permute.xlu0 %134  ;;  %1094 = vmatprep.mubr.msk.f32.mxu1 %vm208_vm2, %v1341_v55  ;;  %v170_v62 = vpop.permute.xlu1 %169 }
 0x25d   :  { %vm193_vm4 = vcmp.eq.s32.totalorder %v135_v61, %v1365_v3  ;;  %vm194_vm5 = vcmp.eq.s32.totalorder %v135_v61, %v1370_v6  ;;  %vm210_vm6 = vcmp.eq.s32.totalorder %v170_v62, %v1370_v6  ;;  %vm209_vm7 = vcmp.eq.s32.totalorder %v170_v62, %v1365_v3 }
 0x25e   :  { %1080 = vmatprep.mubr.msk.f32.mxu0 %vm194_vm5, %v1341_v55 }
 0x25f   :  { %1081 = vmatmul.mubr.msk.f32.gmra.mxu0 %vm193_vm4, %v1341_v55  ;;  %1095 = vmatmul.mubr.msk.f32.gmra.mxu1 %vm207_vm3, %v1341_v55 }
 0x260   :  { %v139_v63 = vpop.permute.xlu0 %138  ;;  %1096 = vmatprep.mubr.msk.f32.mxu1 %vm210_vm6, %v1341_v55  ;;  %v174_v0 = vpop.permute.xlu1 %173 }
 0x261   :  { %vm195_vm8 = vcmp.eq.s32.totalorder %v139_v63, %v1365_v3  ;;  %vm196_vm9 = vcmp.eq.s32.totalorder %v139_v63, %v1370_v6  ;;  %vm212_vm10 = vcmp.eq.s32.totalorder %v174_v0, %v1370_v6  ;;  %vm211_vm11 = vcmp.eq.s32.totalorder %v174_v0, %v1365_v3 }
 0x262   :  { %1082 = vmatprep.mubr.msk.f32.mxu0 %vm196_vm9, %v1341_v55 }
 0x263   :  { %1083 = vmatmul.mubr.msk.f32.gmra.mxu0 %vm195_vm8, %v1341_v55  ;;  %1097 = vmatmul.mubr.msk.f32.gmra.mxu1 %vm209_vm7, %v1341_v55  ;;  %vm503_vm8 = vcmask 130048  }
 0x264   :  { %v143_v1 = vpop.permute.xlu0 %142  ;;  %1098 = vmatprep.mubr.msk.f32.mxu1 %vm212_vm10, %v1341_v55  ;;  %v178_v2 = vpop.permute.xlu1 %177 }
 0x265   :  { %vm197_vm12 = vcmp.eq.s32.totalorder %v143_v1, %v1365_v3  ;;  %vm198_vm13 = vcmp.eq.s32.totalorder %v143_v1, %v1370_v6  ;;  %vm214_vm14 = vcmp.eq.s32.totalorder %v178_v2, %v1370_v6  ;;  %vm213_vm15 = vcmp.eq.s32.totalorder %v178_v2, %v1365_v3 }
 0x266   :  { %1084 = vmatprep.mubr.msk.f32.mxu0 %vm198_vm13, %v1341_v55 }
 0x267   :  { %1085 = vmatmul.mubr.msk.f32.gmra.mxu0 %vm197_vm12, %v1341_v55  ;;  %1099 = vmatmul.mubr.msk.f32.gmra.mxu1 %vm211_vm11, %v1341_v55 }
 0x268   :  { %v147_v4 = vpop.permute.xlu0 %146  ;;  %1100 = vmatprep.mubr.msk.f32.mxu1 %vm214_vm14, %v1341_v55  ;;  %v182_v5 = vpop.permute.xlu1 %181 }
 0x269   :  { %vm199_vm0 = vcmp.eq.s32.totalorder %v147_v4, %v1365_v3  ;;  %vm200_vm1 = vcmp.eq.s32.totalorder %v147_v4, %v1370_v6  ;;  %vm216_vm2 = vcmp.eq.s32.totalorder %v182_v5, %v1370_v6  ;;  %vm215_vm3 = vcmp.eq.s32.totalorder %v182_v5, %v1365_v3 }
 0x26a   :  { %1086 = vmatprep.mubr.msk.f32.mxu0 %vm200_vm1, %v1341_v55 }
 0x26b   :  { %1087 = vmatmul.mubr.msk.f32.gmra.mxu0 %vm199_vm0, %v1341_v55  ;;  %1101 = vmatmul.mubr.msk.f32.gmra.mxu1 %vm213_vm15, %v1341_v55 }
 0x26c   :  { %v151_v7 = vpop.permute.xlu0 %150  ;;  %1102 = vmatprep.mubr.msk.f32.mxu1 %vm216_vm2, %v1341_v55  ;;  %v186_v8 = vpop.permute.xlu1 %185 }
 0x26d   :  { %vm201_vm4 = vcmp.eq.s32.totalorder %v151_v7, %v1365_v3  ;;  %vm202_vm5 = vcmp.eq.s32.totalorder %v151_v7, %v1370_v6  ;;  %vm218_vm6 = vcmp.eq.s32.totalorder %v186_v8, %v1370_v6  ;;  %vm217_vm7 = vcmp.eq.s32.totalorder %v186_v8, %v1365_v3 }
 0x26e   :  { %1088 = vmatprep.mubr.msk.f32.mxu0 %vm202_vm5, %v1341_v55 }
 0x26f   :  { %1089 = vmatmul.mubr.msk.f32.gmra.mxu0 %vm201_vm4, %v1341_v55  ;;  %1103 = vmatmul.mubr.msk.f32.gmra.mxu1 %vm215_vm3, %v1341_v55 }
 0x270   :  { %1104 = vmatprep.mubr.msk.f32.mxu1 %vm218_vm6, %v1341_v55 }
 0x273   :  { %1105 = vmatmul.mubr.msk.f32.gmra.mxu1 %vm217_vm7, %v1341_v55 }
 0x313   :  { %v357_v9 = vpop.f32.mrf.mxu0 }
 0x314   :  { %1186 = vmatprep.mubr.msk.f32.mxu0 %vm503_vm8, %v357_v9 }
 0x315   :  { %v359_v10 = vpop.f32.mrf.mxu0 }
 0x317   :  { %v362_v11 = vpop.f32.mrf.mxu0  ;;  %v462_v12 = vpop.f32.mrf.mxu1 }
 0x318   :  { %1187 = vmatmul.mubr.msk.f32.vlgmr.msra.gmra.mxu0 %vm503_vm8, %v362_v11  ;;  %1202 = vmatprep.mubr.msk.f32.mxu1 %vm503_vm8, %v462_v12 }
 0x319   :  { %v364_v6 = vpop.f32.mrf.mxu0  ;;  %v464_v13 = vpop.f32.mrf.mxu1 }
 0x31b   :  { %v367_v14 = vpop.f32.mrf.mxu0  ;;  %v467_v15 = vpop.f32.mrf.mxu1 }
 0x31c   :  { %1203 = vmatmul.mubr.msk.f32.vlgmr.msra.gmra.mxu1 %vm503_vm8, %v467_v15  ;;  %1189 = vmatprep.mubr.msk.f32.mxu0 %vm503_vm8, %v367_v14 }
 0x31d   :  { %v369_v16 = vpop.f32.mrf.mxu0  ;;  %v469_v17 = vpop.f32.mrf.mxu1 }
 0x31f   :  { %v372_v18 = vpop.f32.mrf.mxu0  ;;  %v472_v19 = vpop.f32.mrf.mxu1 }
 0x320   :  { %1190 = vmatmul.mubr.msk.f32.gmra.mxu0 %vm503_vm8, %v372_v18  ;;  %1205 = vmatprep.mubr.msk.f32.mxu1 %vm503_vm8, %v472_v19 }
 0x321   :  { %v374_v20 = vpop.f32.mrf.mxu0  ;;  %v474_v21 = vpop.f32.mrf.mxu1 }
 0x323   :  { %v377_v22 = vpop.f32.mrf.mxu0  ;;  %v477_v23 = vpop.f32.mrf.mxu1 }
 0x324   :  { %1206 = vmatmul.mubr.msk.f32.gmra.mxu1 %vm503_vm8, %v477_v23  ;;  %1192 = vmatprep.mubr.msk.f32.mxu0 %vm503_vm8, %v377_v22 }
 0x325   :  { %v379_v24 = vpop.f32.mrf.mxu0  ;;  %v479_v25 = vpop.f32.mrf.mxu1 }
 0x327   :  { %v382_v26 = vpop.f32.mrf.mxu0  ;;  %v482_v27 = vpop.f32.mrf.mxu1 }
 0x328   :  { %1193 = vmatmul.mubr.msk.f32.gmra.mxu0 %vm503_vm8, %v382_v26  ;;  %1208 = vmatprep.mubr.msk.f32.mxu1 %vm503_vm8, %v482_v27 }
 0x329   :  { %v384_v28 = vpop.f32.mrf.mxu0  ;;  %v484_v29 = vpop.f32.mrf.mxu1 }
 0x32b   :  { %v387_v30 = vpop.f32.mrf.mxu0  ;;  %v487_v31 = vpop.f32.mrf.mxu1 }
 0x32c   :  { %1209 = vmatmul.mubr.msk.f32.gmra.mxu1 %vm503_vm8, %v487_v31  ;;  %1195 = vmatprep.mubr.msk.f32.mxu0 %vm503_vm8, %v387_v30 }
 0x32d   :  { %v389_v32 = vpop.f32.mrf.mxu0  ;;  %v489_v33 = vpop.f32.mrf.mxu1 }
 0x32f   :  { %v392_v34 = vpop.f32.mrf.mxu0  ;;  %v492_v35 = vpop.f32.mrf.mxu1 }
 0x330   :  { %1196 = vmatmul.mubr.msk.f32.gmra.mxu0 %vm503_vm8, %v392_v34  ;;  %1211 = vmatprep.mubr.msk.f32.mxu1 %vm503_vm8, %v492_v35 }
 0x331   :  { %v394_v36 = vpop.f32.mrf.mxu0  ;;  %v494_v37 = vpop.f32.mrf.mxu1 }
 0x333   :  { %v497_v38 = vpop.f32.mrf.mxu1 }
 0x334   :  { %1212 = vmatmul.mubr.msk.f32.gmra.mxu1 %vm503_vm8, %v497_v38 }
 0x335   :  { %v499_v39 = vpop.f32.mrf.mxu1 }
 0x3d8   :  { %v1469_v41 = vpop.f32.mrf.mxu0 }
 0x3d9   :  { %vm634_vm9 = vcmp.gt.f32.partialorder %v1469_v41, 0.3 }
 0x3da   :  { %v1472_v42 = vpop.f32.mrf.mxu0  ;;  %v1115_v44 = vsel %vm634_vm9, 1.0, %v1343_v43 }
 0x3db   :  { %v658_v45 = vmul.f32 %v1469_v41, %v1115_v44  ;;  %vm633_vm10 = vcmp.gt.f32.partialorder %v1472_v42, 0.3 }
 0x3dc   :  { %v1476_v46 = vpop.f32.mrf.mxu1  ;;  %v1114_v52 = vsel %vm633_vm10, 1.0, %v1343_v43 }
 0x3dd   :  { %vm894_vm11 = vcmp.gt.f32.partialorder %v1476_v46, 0.3  ;;  %672 = vperm.xlu1 %1256, %v658_v45   ;;  %v657_v55 = vmul.f32 %v1114_v52, %v1472_v42 }
 0x3de   :  { %v1480_v47 = vpop.f32.mrf.mxu1  ;;  %v1139_v48 = vsel %vm894_vm11, 1.0, %v1343_v43  ;;  %vm745_vm11 = vcmp.ge.s32.totalorder %v1365_v3, 5 }
 0x3df   :  { %vm893_vm12 = vcmp.gt.f32.partialorder %v1480_v47, 0.3  ;;  %v918_v49 = vmul.f32 %v1476_v46, %v1139_v48 }
 0x3e0   :  { %v1485_v50 = vpop.f32.mrf.mxu0  ;;  %v1138_v51 = vsel %vm893_vm12, 1.0, %v1343_v43 }
 0x3e1   :  { %vm636_vm13 = vcmp.gt.f32.partialorder %v1485_v50, 0.3  ;;  %932 = vperm.xlu0 %1257, %v918_v49   ;;  %v917_v53 = vmul.f32 %v1138_v51, %v1480_v47 }
 0x3e2   :  { %v1491_v54 = vpop.f32.mrf.mxu0  ;;  %v1117_v58 = vsel %vm636_vm13, 1.0, %v1343_v43 }
 0x3e3   :  { %vm635_vm14 = vcmp.gt.f32.partialorder %v1491_v54, 0.3  ;;  %927 = vperm.xlu1 %1256, %v917_v53   ;;  %v660_v61 = vmul.f32 %v1485_v50, %v1117_v58 }
 0x3e4   :  { %v1495_v56 = vpop.f32.mrf.mxu1  ;;  %v1116_v57 = vsel %vm635_vm14, 1.0, %v1343_v43 }
 0x3e5   :  { %vm896_vm15 = vcmp.gt.f32.partialorder %v1495_v56, 0.3  ;;  %667 = vperm.xlu0 %1257, %v657_v55   ;;  %v659_v59 = vmul.f32 %v1116_v57, %v1491_v54 }
 0x3e6   :  { %v1501_v60 = vpop.f32.mrf.mxu1  ;;  %v1141_v0 = vsel %vm896_vm15, 1.0, %v1343_v43 }
 0x3e7   :  { %vm895_vm0 = vcmp.gt.f32.partialorder %v1501_v60, 0.3  ;;  %677 = vperm.xlu1 %1256, %v659_v59   ;;  %v920_v4 = vmul.f32 %v1495_v56, %v1141_v0 }
 0x3e8   :  { %v1505_v62 = vpop.f32.mrf.mxu0  ;;  %v1140_v63 = vsel %vm895_vm0, 1.0, %v1343_v43 }
 0x3e9   :  { %vm638_vm1 = vcmp.gt.f32.partialorder %v1505_v62, 0.3  ;;  %682 = vperm.xlu0 %1257, %v660_v61   ;;  %v919_v1 = vmul.f32 %v1140_v63, %v1501_v60 }
 0x3ea   :  { %v1511_v2 = vpop.f32.mrf.mxu0  ;;  %v1119_v8 = vsel %vm638_vm1, 1.0, %v1343_v43 }
 0x3eb   :  { %vm637_vm2 = vcmp.gt.f32.partialorder %v1511_v2, 0.3  ;;  %937 = vperm.xlu1 %1256, %v919_v1   ;;  %v662_v11 = vmul.f32 %v1505_v62, %v1119_v8 }
 0x3ec   :  { %v1515_v5 = vpop.f32.mrf.mxu1  ;;  %v1118_v7 = vsel %vm637_vm2, 1.0, %v1343_v43 }
 0x3ed   :  { %vm898_vm3 = vcmp.gt.f32.partialorder %v1515_v5, 0.3  ;;  %942 = vperm.xlu0 %1257, %v920_v4   ;;  %v661_v9 = vmul.f32 %v1118_v7, %v1511_v2 }
 0x3ee   :  { %v1521_v10 = vpop.f32.mrf.mxu1  ;;  %v1143_v13 = vsel %vm898_vm3, 1.0, %v1343_v43 }
 0x3ef   :  { %vm897_vm4 = vcmp.gt.f32.partialorder %v1521_v10, 0.3  ;;  %687 = vperm.xlu1 %1256, %v661_v9   ;;  %v922_v16 = vmul.f32 %v1515_v5, %v1143_v13 }
 0x3f0   :  { %v1525_v12 = vpop.f32.mrf.mxu0  ;;  %v1142_v6 = vsel %vm897_vm4, 1.0, %v1343_v43 }
 0x3f1   :  { %vm640_vm5 = vcmp.gt.f32.partialorder %v1525_v12, 0.3  ;;  %692 = vperm.xlu0 %1257, %v662_v11   ;;  %v921_v14 = vmul.f32 %v1142_v6, %v1521_v10 }
 0x3f2   :  { %v1531_v15 = vpop.f32.mrf.mxu0  ;;  %v1121_v19 = vsel %vm640_vm5, 1.0, %v1343_v43 }
 0x3f3   :  { %vm639_vm6 = vcmp.gt.f32.partialorder %v1531_v15, 0.3  ;;  %947 = vperm.xlu1 %1256, %v921_v14   ;;  %v664_v22 = vmul.f32 %v1525_v12, %v1121_v19 }
 0x3f4   :  { %v1120_v17 = vsel %vm639_vm6, 1.0, %v1343_v43  ;;  %v1536_v18 = vpop.f32.mrf.mxu1 }
 0x3f5   :  { %v663_v20 = vmul.f32 %v1120_v17, %v1531_v15  ;;  %vm900_vm7 = vcmp.gt.f32.partialorder %v1536_v18, 0.3  ;;  %952 = vperm.xlu0 %1257, %v922_v16  }
 0x3f6   :  { %v1541_v21 = vpop.f32.mrf.mxu1  ;;  %v1145_v24 = vsel %vm900_vm7, 1.0, %v1343_v43 }
 0x3f7   :  { %vm899_vm9 = vcmp.gt.f32.partialorder %v1541_v21, 0.3  ;;  %697 = vperm.xlu1 %1256, %v663_v20   ;;  %v924_v26 = vmul.f32 %v1536_v18, %v1145_v24 }
 0x3f8   :  { %v1144_v23 = vsel %vm899_vm9, 1.0, %v1343_v43 }
 0x3f9   :  { %v923_v25 = vmul.f32 %v1144_v23, %v1541_v21  ;;  %702 = vperm.xlu0 %1257, %v664_v22  }
 0x3fb   :  { %957 = vperm.xlu1 %1256, %v923_v25  }
 0x3fd   :  { %962 = vperm.xlu0 %1257, %v924_v26  }
 0x458   :  { %v673_v27 = vpop.permute.xlu1 %672 }
 0x459   :  { %v706_v28 = vmul.f32 %v1469_v41, %v673_v27 }
 0x45b   :  { %vm714_vm10 = vcmp.gt.f32.partialorder %v706_v28, 0.3 }
 0x45c   :  { %v1123_v29 = vsel %vm714_vm10, 1.0, %v1343_v43  ;;  %v933_v30 = vpop.permute.xlu0 %932 }
 0x45d   :  { %v738_v31 = vmul.f32 %v1123_v29, %v706_v28  ;;  %v966_v32 = vmul.f32 %v1476_v46, %v933_v30 }
 0x45e   :  { %v928_v33 = vpop.permute.xlu1 %927 }
 0x45f   :  { %v747_v34 = vsel %vm745_vm11, %v738_v31, %v1469_v41  ;;  %vm974_vm12 = vcmp.gt.f32.partialorder %v966_v32, 0.3  ;;  %v965_v35 = vmul.f32 %v928_v33, %v1480_v47 }
 0x460   :  { %755 = vst.msk [vmem:[%s1696_s2 + $0x8] sm:$0xff] %vm503_vm8, %v747_v34  ;;  %v1147_v36 = vsel %vm974_vm12, 1.0, %v1343_v43  ;;  %v668_v37 = vpop.permute.xlu0 %667 }
 0x461   :  { %v998_v38 = vmul.f32 %v1147_v36, %v966_v32  ;;  %vm973_vm13 = vcmp.gt.f32.partialorder %v965_v35, 0.3  ;;  %v705_v39 = vmul.f32 %v668_v37, %v1472_v42 }
 0x462   :  { %v1146_v40 = vsel %vm973_vm13, 1.0, %v1343_v43  ;;  %v678_v44 = vpop.permute.xlu1 %677 }
 0x463   :  { %v1006_v41 = vsel %vm745_vm11, %v998_v38, %v1476_v46  ;;  %v997_v45 = vmul.f32 %v1146_v40, %v965_v35  ;;  %vm713_vm14 = vcmp.gt.f32.partialorder %v705_v39, 0.3  ;;  %v707_v48 = vmul.f32 %v678_v44, %v1491_v54 }
 0x464   :  { %1155 = vst.msk [vmem:[%s1696_s2 + $0x48] sm:$0xff] %vm503_vm8, %v1006_v41  ;;  %v1122_v49 = vsel %vm713_vm14, 1.0, %v1343_v43  ;;  %v683_v51 = vpop.permute.xlu0 %682 }
 0x465   :  { %v1005_v52 = vsel %vm745_vm11, %v997_v45, %v1480_v47  ;;  %v737_v53 = vmul.f32 %v1122_v49, %v705_v39  ;;  %vm715_vm15 = vcmp.gt.f32.partialorder %v707_v48, 0.3  ;;  %v708_v46 = vmul.f32 %v1485_v50, %v683_v51 }
 0x466   :  { %1154 = vst.msk [vmem:[%s1696_s2 + $0x40] sm:$0xff] %vm503_vm8, %v1005_v52  ;;  %v1124_v55 = vsel %vm715_vm15, 1.0, %v1343_v43  ;;  %v938_v57 = vpop.permute.xlu1 %937 }
 0x467   :  { %v746_v58 = vsel %vm745_vm11, %v737_v53, %v1472_v42  ;;  %v739_v59 = vmul.f32 %v1124_v55, %v707_v48  ;;  %vm716_vm0 = vcmp.gt.f32.partialorder %v708_v46, 0.3  ;;  %v967_v47 = vmul.f32 %v938_v57, %v1501_v60 }
 0x468   :  { %754 = vst.msk [vmem:[%s1696_s2] sm:$0xff] %vm503_vm8, %v746_v58  ;;  %v1125_v61 = vsel %vm716_vm0, 1.0, %v1343_v43  ;;  %v943_v63 = vpop.permute.xlu0 %942 }
 0x469   :  { %v748_v0 = vsel %vm745_vm11, %v739_v59, %v1491_v54  ;;  %v740_v1 = vmul.f32 %v1125_v61, %v708_v46  ;;  %vm975_vm1 = vcmp.gt.f32.partialorder %v967_v47, 0.3  ;;  %v968_v42 = vmul.f32 %v1495_v56, %v943_v63 }
 0x46a   :  { %756 = vst.msk [vmem:[%s1696_s2 + $0x10] sm:$0xff] %vm503_vm8, %v748_v0  ;;  %v1148_v4 = vsel %vm975_vm1, 1.0, %v1343_v43  ;;  %v688_v7 = vpop.permute.xlu1 %687 }
 0x46b   :  { %v749_v8 = vsel %vm745_vm11, %v740_v1, %v1485_v50  ;;  %v999_v9 = vmul.f32 %v1148_v4, %v967_v47  ;;  %vm976_vm2 = vcmp.gt.f32.partialorder %v968_v42, 0.3  ;;  %v709_v54 = vmul.f32 %v688_v7, %v1511_v2 }
 0x46c   :  { %757 = vst.msk [vmem:[%s1696_s2 + $0x18] sm:$0xff] %vm503_vm8, %v749_v8  ;;  %v1149_v11 = vsel %vm976_vm2, 1.0, %v1343_v43  ;;  %v693_v6 = vpop.permute.xlu0 %692 }
 0x46d   :  { %v1007_v13 = vsel %vm745_vm11, %v999_v9, %v1501_v60  ;;  %v1000_v14 = vmul.f32 %v1149_v11, %v968_v42  ;;  %vm717_vm3 = vcmp.gt.f32.partialorder %v709_v54, 0.3  ;;  %v710_v50 = vmul.f32 %v1505_v62, %v693_v6 }
 0x46e   :  { %1156 = vst.msk [vmem:[%s1696_s2 + $0x50] sm:$0xff] %vm503_vm8, %v1007_v13  ;;  %v1126_v16 = vsel %vm717_vm3, 1.0, %v1343_v43  ;;  %v948_v17 = vpop.permute.xlu1 %947 }
 0x46f   :  { %v1008_v19 = vsel %vm745_vm11, %v1000_v14, %v1495_v56  ;;  %v741_v20 = vmul.f32 %v1126_v16, %v709_v54  ;;  %vm718_vm4 = vcmp.gt.f32.partialorder %v710_v50, 0.3  ;;  %v969_v60 = vmul.f32 %v948_v17, %v1521_v10 }
 0x470   :  { %1157 = vst.msk [vmem:[%s1696_s2 + $0x58] sm:$0xff] %vm503_vm8, %v1008_v19  ;;  %v1127_v22 = vsel %vm718_vm4, 1.0, %v1343_v43  ;;  %v953_v23 = vpop.permute.xlu0 %952 }
 0x471   :  { %v750_v24 = vsel %vm745_vm11, %v741_v20, %v1511_v2  ;;  %v742_v25 = vmul.f32 %v1127_v22, %v710_v50  ;;  %vm977_vm5 = vcmp.gt.f32.partialorder %v969_v60, 0.3  ;;  %v970_v56 = vmul.f32 %v1515_v5, %v953_v23 }
 0x472   :  { %758 = vst.msk [vmem:[%s1696_s2 + $0x20] sm:$0xff] %vm503_vm8, %v750_v24  ;;  %v1150_v26 = vsel %vm977_vm5, 1.0, %v1343_v43  ;;  %v698_v27 = vpop.permute.xlu1 %697 }
 0x473   :  { %v751_v28 = vsel %vm745_vm11, %v742_v25, %v1505_v62  ;;  %v1001_v29 = vmul.f32 %v1150_v26, %v969_v60  ;;  %vm978_vm6 = vcmp.gt.f32.partialorder %v970_v56, 0.3  ;;  %v711_v2 = vmul.f32 %v698_v27, %v1531_v15 }
 0x474   :  { %759 = vst.msk [vmem:[%s1696_s2 + $0x28] sm:$0xff] %vm503_vm8, %v751_v28  ;;  %v1151_v30 = vsel %vm978_vm6, 1.0, %v1343_v43  ;;  %v703_v31 = vpop.permute.xlu0 %702 }
 0x475   :  { %v1009_v32 = vsel %vm745_vm11, %v1001_v29, %v1521_v10  ;;  %v1002_v33 = vmul.f32 %v1151_v30, %v970_v56  ;;  %vm719_vm7 = vcmp.gt.f32.partialorder %v711_v2, 0.3  ;;  %v712_v62 = vmul.f32 %v1525_v12, %v703_v31 }
 0x476   :  { %1158 = vst.msk [vmem:[%s1696_s2 + $0x60] sm:$0xff] %vm503_vm8, %v1009_v32  ;;  %v1128_v34 = vsel %vm719_vm7, 1.0, %v1343_v43  ;;  %v958_v35 = vpop.permute.xlu1 %957 }
 0x477   :  { %v1010_v36 = vsel %vm745_vm11, %v1002_v33, %v1515_v5  ;;  %v743_v37 = vmul.f32 %v1128_v34, %v711_v2  ;;  %vm720_vm9 = vcmp.gt.f32.partialorder %v712_v62, 0.3  ;;  %v971_v10 = vmul.f32 %v958_v35, %v1541_v21 }
 0x478   :  { %1159 = vst.msk [vmem:[%s1696_s2 + $0x68] sm:$0xff] %vm503_vm8, %v1010_v36  ;;  %v1129_v38 = vsel %vm720_vm9, 1.0, %v1343_v43  ;;  %v963_v39 = vpop.permute.xlu0 %962 }
 0x479   :  { %v752_v40 = vsel %vm745_vm11, %v743_v37, %v1531_v15  ;;  %v744_v44 = vmul.f32 %v1129_v38, %v712_v62  ;;  %vm979_vm10 = vcmp.gt.f32.partialorder %v971_v10, 0.3  ;;  %v972_v5 = vmul.f32 %v1536_v18, %v963_v39 }
 0x47a   :  { %760 = vst.msk [vmem:[%s1696_s2 + $0x30] sm:$0xff] %vm503_vm8, %v752_v40  ;;  %v1152_v41 = vsel %vm979_vm10, 1.0, %v1343_v43 }
 0x47b   :  { %v753_v45 = vsel %vm745_vm11, %v744_v44, %v1525_v12  ;;  %v1003_v48 = vmul.f32 %v1152_v41, %v971_v10  ;;  %vm980_vm12 = vcmp.gt.f32.partialorder %v972_v5, 0.3 }
 0x47c   :  { %761 = vst.msk [vmem:[%s1696_s2 + $0x38] sm:$0xff] %vm503_vm8, %v753_v45  ;;  %v1153_v15 = vsel %vm980_vm12, 1.0, %v1343_v43 }
 0x47d   :  { %v1011_v49 = vsel %vm745_vm11, %v1003_v48, %v1541_v21  ;;  %v1004_v51 = vmul.f32 %v1153_v15, %v972_v5 }
 0x47e   :  { %1160 = vst.msk [vmem:[%s1696_s2 + $0x70] sm:$0xff] %vm503_vm8, %v1011_v49 }
 0x47f   :  { %v1012_v12 = vsel %vm745_vm11, %v1004_v51, %v1536_v18 }
 0x480   :  { %1161 = vst.msk [vmem:[%s1696_s2 + $0x78] sm:$0xff] %vm503_vm8, %v1012_v12 }
 0x481   :  { %1026 = vsyncpa [#allocation3], 1 }
 0x482   :  { %1027 = vsyncpa [#allocation5], 1 }

</bundles_post_ra>
